<compile_context>
chip_gen: v7x
topology: tpu7x:2x2x1
jax: 0.10.0
libtpu: 0.0.40
codegen_flags: <defaults>
</compile_context>

<pallas_src>
import jax
import jax.numpy as jnp
from jax import lax
from jax.experimental import pallas as pl
from jax.experimental.pallas import tpu as pltpu


# ---------------------------------------------------------------------------
# pltpu.roll direction probe (expected to match jnp.roll; verified at runtime)
# ---------------------------------------------------------------------------

_ROLL_LIKE_JNP = True


def _resolve_roll_semantics():
    """Probe pltpu.roll once so the im2col works under either rotate convention."""
    global _ROLL_LIKE_JNP

    def k(x_ref, o_ref):
        o_ref[...] = pltpu.roll(x_ref[...], 3, axis=1)

    x = jnp.arange(8 * 128, dtype=jnp.float32).reshape(8, 128)
    y = pl.pallas_call(k, out_shape=jax.ShapeDtypeStruct((8, 128), jnp.float32))(x)
    _ROLL_LIKE_JNP = bool(jnp.array_equal(y, jnp.roll(x, 3, axis=1)))


# ---------------------------------------------------------------------------
# In-kernel helpers
# ---------------------------------------------------------------------------

def _sigmoid(v):
    # exact: sigmoid(v) = 0.5 * (1 + tanh(v/2)); one EUP op + cheap VPU ops.
    return 0.5 * jnp.tanh(0.5 * v) + 0.5


def _silu(y):
    return y * (0.5 * jnp.tanh(0.5 * y) + 0.5)


def _edge_masks(H, W, HWp):
    """0/1 float boundary masks for a stride-1 / pad-1 3x3 conv, at (1, HWp)."""
    lane = lax.broadcasted_iota(jnp.int32, (1, HWp), 1)
    yy = lane // W
    xx = lane - yy * W
    row_top = jnp.where(yy >= 1, 1.0, 0.0)        # reading row y-1 is in-bounds
    row_bot = jnp.where(yy < H - 1, 1.0, 0.0)     # reading row y+1 is in-bounds
    col_lft = jnp.where(xx >= 1, 1.0, 0.0)        # reading col x-1 is in-bounds
    col_rgt = jnp.where(xx < W - 1, 1.0, 0.0)     # reading col x+1 is in-bounds
    return row_top, row_bot, col_lft, col_rgt


def _im2col_3x3(x, W, HWp, masks, roll_like_jnp, tap_scale=None):
    """Patch matrix of a stride-1/pad-1 3x3 conv, built with lane rolls.

    x: (C, HWp) channel-major feature map (p = y*W + x, row-major).
    Returns P: (9*C, HWp) with P[(ky*3+kx)*C + ci, p] = x[ci, y+ky-1, x+kx-1]
    (0 outside the image), optionally scaled per tap by tap_scale[(ky*3+kx)].
    Lane-padding columns (p >= H*W) are don't-care (masked at the consumers).
    """
    row_top, row_bot, col_lft, col_rgt = masks
    tap_masks = (
        row_top * col_lft, row_top, row_top * col_rgt,
        col_lft,           None,    col_rgt,
        row_bot * col_lft, row_bot, row_bot * col_rgt,
    )
    parts = []
    tap = 0
    for dy in (-1, 0, 1):
        for dx in (-1, 0, 1):
            off = dy * W + dx
            if off == 0:
                shifted = x
            else:
                shift = (-off) % HWp if roll_like_jnp else off % HWp
                shifted = pltpu.roll(x, shift, axis=1)   # shifted[p] = x[p + off]
            m = tap_masks[tap]
            if tap_scale is not None:
                s = tap_scale[tap:tap + 1, 0:1]           # (1,1) spatial attention
                m = s if m is None else m * s
            if m is not None:
                shifted = shifted * m
            parts.append(shifted)
            tap += 1
    return jnp.concatenate(parts, axis=0)                 # (9*C, HWp)


# ---------------------------------------------------------------------------
# Fused C2f_OD kernel (one grid step per batch element)
# ---------------------------------------------------------------------------

def _make_c2f_od_kernel(c, H, W, HW, HWp, roll_like_jnp):
    inv_hw = 1.0 / HW
    bf16 = jnp.bfloat16
    f32 = jnp.float32

    def kernel(x_ref, w1_ref, s1_ref, b1_ref, wb_ref, sb_ref, bb_ref,
               fct_ref, cht_ref, chb_ref, flt_ref, flb_ref,
               spt_ref, spb_ref, knt_ref, knb_ref, odw_ref,
               w2a_ref, w2b_ref, s2_ref, b2_ref, o_ref):
        x = x_ref[0]                                               # (C1, HWp) bf16

        # ---- C2f.cv1: 1x1 conv + folded BN + SiLU ------------------------
        y = jnp.dot(w1_ref[...], x, preferred_element_type=f32)   # (2c, HWp)
        y = _silu(y * s1_ref[...] + b1_ref[...])

        masks = _edge_masks(H, W, HWp)                             # (1, HWp) each

        # ---- Bottleneck_OD.cv1: 3x3 conv (single im2col matmul) ----------
        y2 = y[c:, :]                                              # chunk(2)[1]
        p1 = _im2col_3x3(y2, W, HWp, masks, roll_like_jnp).astype(bf16)
        t = jnp.dot(wb_ref[...], p1, preferred_element_type=f32)  # (c, HWp)
        t = _silu(t * sb_ref[...] + bb_ref[...])

        # ---- ODConv attention head (fused; column-vector math) -----------
        if HWp != HW:   # mask lane padding out of the global average pool
            lane = lax.broadcasted_iota(jnp.int32, (1, HWp), 1)
            t_pool = t * jnp.where(lane < HW, 1.0, 0.0)
        else:
            t_pool = t
        pooled = jnp.sum(t_pool, axis=1, keepdims=True) * inv_hw   # (c, 1)
        a = jnp.maximum(
            jnp.dot(fct_ref[...], pooled, preferred_element_type=f32), 0.0)  # (att,1)
        ch = _sigmoid(jnp.dot(cht_ref[...], a, preferred_element_type=f32)
                      + chb_ref[...])                               # (c, 1)
        fl = _sigmoid(jnp.dot(flt_ref[...], a, preferred_element_type=f32)
                      + flb_ref[...])                               # (c, 1)
        sp = _sigmoid(jnp.dot(spt_ref[...], a, preferred_element_type=f32)
                      + spb_ref[...])                               # (9, 1)
        kl = jnp.dot(knt_ref[...], a, preferred_element_type=f32) + knb_ref[...]  # (K,1)

        # softmax over the K candidate kernels, unrolled on (1,1) scalars
        K = kl.shape[0]
        logits = [kl[k:k + 1, 0:1] for k in range(K)]
        m = logits[0]
        for k in range(1, K):
            m = jnp.maximum(m, logits[k])
        exps = [jnp.exp(l - m) for l in logits]
        ssum = exps[0]
        for k in range(1, K):
            ssum = ssum + exps[k]
        inv_s = 1.0 / ssum

        # aggregated dynamic weight: sum_k softmax_k * W_k, scaled by the
        # filter attention (per output channel).  Exact fold: conv is linear
        # and bias-free.
        agg = (exps[0] * inv_s) * odw_ref[0]
        for k in range(1, K):
            agg = agg + (exps[k] * inv_s) * odw_ref[k]
        agg = (agg * fl).astype(bf16)                               # (c, 9c)

        # ---- ODConv dynamic 3x3 conv: channel attn on the input, spatial
        # attn folded per tap into the patch build ---------------------------
        p2 = _im2col_3x3(t * ch, W, HWp, masks, roll_like_jnp,
                         tap_scale=sp).astype(bf16)                 # (9c, HWp)
        od = jnp.dot(agg, p2, preferred_element_type=f32)           # (c, HWp)

        # ---- C2f.cv2 over the implicit concat([y1, y2, od]) ----------------
        z = jnp.dot(w2a_ref[...], y.astype(bf16), preferred_element_type=f32)
        z = z + jnp.dot(w2b_ref[...], od.astype(bf16), preferred_element_type=f32)
        o_ref[0] = _silu(z * s2_ref[...] + b2_ref[...]).astype(o_ref.dtype)

    return kernel


# ---------------------------------------------------------------------------
# C2f_OD forward (n=1, shortcut=False, g=1) — one pallas_call
# ---------------------------------------------------------------------------

def c2f_od_forward(x_nchw, params, out_dtype=jnp.bfloat16):
    B, C1, H, W = x_nchw.shape
    c = params['c']
    C2 = params['cv2_s'].shape[0]
    att = params['fcT'].shape[0]
    K = params['od_w'].shape[0]
    HW = H * W
    HWp = ((HW + 127) // 128) * 128               # lane-dense spatial axis

    x = x_nchw.reshape(B, C1, HW)
    if HWp != HW:
        x = jnp.pad(x, ((0, 0), (0, 0), (0, HWp - HW)))
    x = x.astype(jnp.bfloat16)

    # Rough per-step VMEM need (I/O blocks + dominant intermediates); keep the
    # scoped limit explicit so real feature-map sizes do not hit the 32 MiB
    # default, but never ask for more than the smallest (v7x) physical VMEM.
    est = 4 * HWp * (2 * C1 + 2 * C2 + 2 * 2 * c + 4 * c + 2 * 9 * c)
    vmem_limit = int(min(max(32 * 2**20, 2 * est), 64 * 2**20))

    kernel = _make_c2f_od_kernel(c, H, W, HW, HWp, _ROLL_LIKE_JNP)

    out = pl.pallas_call(
        kernel,
        out_shape=jax.ShapeDtypeStruct((B, C2, HWp), out_dtype),
        grid=(B,),
        in_specs=[
            pl.BlockSpec((1, C1, HWp), lambda b: (b, 0, 0)),     # x
            pl.BlockSpec((2 * c, C1), lambda b: (0, 0)),         # cv1 weight
            pl.BlockSpec((2 * c, 1), lambda b: (0, 0)),          # cv1 bn scale
            pl.BlockSpec((2 * c, 1), lambda b: (0, 0)),          # cv1 bn bias
            pl.BlockSpec((c, 9 * c), lambda b: (0, 0)),          # bottleneck cv1 weight
            pl.BlockSpec((c, 1), lambda b: (0, 0)),              # bn scale
            pl.BlockSpec((c, 1), lambda b: (0, 0)),              # bn bias
            pl.BlockSpec((att, c), lambda b: (0, 0)),            # attention fc^T
            pl.BlockSpec((c, att), lambda b: (0, 0)),            # channel fc^T
            pl.BlockSpec((c, 1), lambda b: (0, 0)),              # channel bias
            pl.BlockSpec((c, att), lambda b: (0, 0)),            # filter fc^T
            pl.BlockSpec((c, 1), lambda b: (0, 0)),              # filter bias
            pl.BlockSpec((9, att), lambda b: (0, 0)),            # spatial fc^T
            pl.BlockSpec((9, 1), lambda b: (0, 0)),              # spatial bias
            pl.BlockSpec((K, att), lambda b: (0, 0)),            # kernel fc^T
            pl.BlockSpec((K, 1), lambda b: (0, 0)),              # kernel bias
            pl.BlockSpec((K, c, 9 * c), lambda b: (0, 0, 0)),    # ODConv weight bank
            pl.BlockSpec((C2, 2 * c), lambda b: (0, 0)),         # cv2 weight (y part)
            pl.BlockSpec((C2, c), lambda b: (0, 0)),             # cv2 weight (od part)
            pl.BlockSpec((C2, 1), lambda b: (0, 0)),             # cv2 bn scale
            pl.BlockSpec((C2, 1), lambda b: (0, 0)),             # cv2 bn bias
        ],
        out_specs=pl.BlockSpec((1, C2, HWp), lambda b: (b, 0, 0)),
        compiler_params=pltpu.CompilerParams(
            dimension_semantics=("parallel",),
            vmem_limit_bytes=vmem_limit),
    )(x,
      params['cv1_w'], params['cv1_s'][:, None], params['cv1_b'][:, None],
      params['b_cv1_w'], params['b_cv1_s'][:, None], params['b_cv1_b'][:, None],
      params['fcT'],
      params['chT'], params['chb'][:, None],
      params['flT'], params['flb'][:, None],
      params['spT'], params['spb'][:, None],
      params['knT'], params['knb'][:, None],
      params['od_w'],
      params['cv2_wa'], params['cv2_wb'],
      params['cv2_s'][:, None], params['cv2_b'][:, None])

    if HWp != HW:
        out = out[:, :, :HW]
    return out.reshape(B, C2, H, W)                              # NCHW


# ---------------------------------------------------------------------------
# Parameter initialization (deterministic, synthetic; both layouts kept so the
# Pallas path can be validated against a pure-JAX reference).
# ---------------------------------------------------------------------------

def init_params(key, c1, c2, e=0.5, kernel_num=4):
    c = int(c2 * e)
    att = max(int(c * 0.0625), 16)
    keys = iter(jax.random.split(key, 32))

    def nxt():
        return next(keys)

    def kaiming(shape, fan_out):
        return jax.random.normal(nxt(), shape, jnp.float32) * jnp.sqrt(2.0 / fan_out)

    def bn_fold(ch_):
        gamma = 1.0 + 0.1 * jax.random.normal(nxt(), (ch_,), jnp.float32)
        beta = 0.1 * jax.random.normal(nxt(), (ch_,), jnp.float32)
        mean = 0.1 * jax.random.normal(nxt(), (ch_,), jnp.float32)
        var = jnp.abs(jax.random.normal(nxt(), (ch_,), jnp.float32)) + 0.5
        scale = gamma / jnp.sqrt(var + 1e-3)     # ultralytics BN eps = 1e-3
        return scale, beta - mean * scale

    # PyTorch-layout weights (used by the pure-JAX reference)
    cv1_w = kaiming((2 * c, c1, 1, 1), 2 * c)                 # C2f.cv1   OIHW
    b_cv1_w = kaiming((c, c, 3, 3), c * 9)                    # Bottleneck_OD.cv1
    od_w = kaiming((kernel_num, c, c, 3, 3), c * 9)           # ODConv2d.weight
    cv2_w = kaiming((c2, 3 * c, 1, 1), c2)                    # C2f.cv2

    cv1_s, cv1_b = bn_fold(2 * c)
    b_cv1_s, b_cv1_b = bn_fold(c)
    cv2_s, cv2_b = bn_fold(c2)

    fc_w = kaiming((c, att), att)
    ch_w = kaiming((att, c), c); ch_b = jnp.zeros((c,), jnp.float32)
    fl_w = kaiming((att, c), c); fl_b = jnp.zeros((c,), jnp.float32)
    sp_w = kaiming((att, 9), 9); sp_b = jnp.zeros((9,), jnp.float32)
    kn_w = kaiming((att, kernel_num), kernel_num)
    kn_b = jnp.zeros((kernel_num,), jnp.float32)

    bf16 = jnp.bfloat16
    return {
        'c': c,
        # TPU layouts: 1x1 weights (Cout, Cin) bf16; 3x3 weights (Cout, 9*Cin),
        # contraction index j = (ky*3+kx)*Cin + ci  (matches _im2col_3x3).
        'cv1_w': cv1_w[:, :, 0, 0].astype(bf16),
        'cv1_s': cv1_s, 'cv1_b': cv1_b,
        'b_cv1_w': jnp.transpose(b_cv1_w, (0, 2, 3, 1)).reshape(c, 9 * c).astype(bf16),
        'b_cv1_s': b_cv1_s, 'b_cv1_b': b_cv1_b,
        'od_w': jnp.transpose(od_w, (0, 1, 3, 4, 2)).reshape(kernel_num, c, 9 * c),
        'cv2_wa': cv2_w[:, :2 * c, 0, 0].astype(bf16),
        'cv2_wb': cv2_w[:, 2 * c:, 0, 0].astype(bf16),
        'cv2_s': cv2_s, 'cv2_b': cv2_b,
        # transposed (column-vector) attention weights for the fused kernel
        'fcT': fc_w.T, 'chT': ch_w.T, 'chb': ch_b,
        'flT': fl_w.T, 'flb': fl_b,
        'spT': sp_w.T, 'spb': sp_b,
        'knT': kn_w.T, 'knb': kn_b,
        # row-major attention weights for the pure-JAX reference
        'od': {'fc_w': fc_w, 'ch_w': ch_w, 'ch_b': ch_b,
               'fl_w': fl_w, 'fl_b': fl_b, 'sp_w': sp_w, 'sp_b': sp_b,
               'kn_w': kn_w, 'kn_b': kn_b},
        'ref': {'cv1_w': cv1_w, 'b_cv1_w': b_cv1_w, 'od_w': od_w, 'cv2_w': cv2_w},
    }


# ---------------------------------------------------------------------------
# Pure-JAX / XLA reference of the PyTorch module (for validation only)
# ---------------------------------------------------------------------------

def _od_attention(pooled, od):
    hp = lax.Precision.HIGHEST
    a = jax.nn.relu(jnp.dot(pooled, od['fc_w'], precision=hp))
    ch = jax.nn.sigmoid(jnp.dot(a, od['ch_w'], precision=hp) + od['ch_b'])
    fl = jax.nn.sigmoid(jnp.dot(a, od['fl_w'], precision=hp) + od['fl_b'])
    sp = jax.nn.sigmoid(jnp.dot(a, od['sp_w'], precision=hp) + od['sp_b'])
    kn = jax.nn.softmax(jnp.dot(a, od['kn_w'], precision=hp) + od['kn_b'], axis=1)
    return ch, fl, sp, kn


def _conv_bn_silu_ref(x, w, s, b, pad):
    y = lax.conv_general_dilated(
        x, w, (1, 1), ((pad, pad), (pad, pad)),
        dimension_numbers=('NCHW', 'OIHW', 'NCHW'),
        precision=lax.Precision.HIGHEST)
    y = y * s[None, :, None, None] + b[None, :, None, None]
    return y * jax.nn.sigmoid(y)


def c2f_od_reference(x, params):
    rp, od, c = params['ref'], params['od'], params['c']
    hp = lax.Precision.HIGHEST
    y = _conv_bn_silu_ref(x, rp['cv1_w'], params['cv1_s'], params['cv1_b'], 0)
    y1, y2 = y[:, :c], y[:, c:]
    t = _conv_bn_silu_ref(y2, rp['b_cv1_w'], params['b_cv1_s'], params['b_cv1_b'], 1)
    # ODConv2d (k=3, kernel_num=4, temperature=1)
    ch, fl, sp, kn = _od_attention(t.mean(axis=(2, 3)), od)
    agg = jnp.einsum('bk,koiyx->boiyx', kn, rp['od_w'], precision=hp)
    agg = agg * sp.reshape(-1, 1, 1, 3, 3)
    ts = t * ch[:, :, None, None]
    od_out = jnp.stack([
        lax.conv_general_dilated(
            ts[i:i + 1], agg[i], (1, 1), ((1, 1), (1, 1)),
            dimension_numbers=('NCHW', 'OIHW', 'NCHW'),
            precision=hp)[0]
        for i in range(x.shape[0])])
    od_out = od_out * fl[:, :, None, None]
    cat = jnp.concatenate([y1, y2, od_out], axis=1)
    return _conv_bn_silu_ref(cat, rp['cv2_w'], params['cv2_s'], params['cv2_b'], 0)


# ---------------------------------------------------------------------------

if __name__ == "__main__":
    key = jax.random.PRNGKey(0)
    kx, kp = jax.random.split(key)

    B, C1, H, W = 2, 16, 16, 16
    C2 = 16
    x = jax.random.normal(kx, (B, C1, H, W), jnp.float32)    # NCHW like PyTorch
    params = init_params(kp, C1, C2)

    _resolve_roll_semantics()                                 # one tiny probe kernel

    fwd = jax.jit(lambda inp: c2f_od_forward(inp, params))
    out = jax.block_until_ready(fwd(x))
    assert out.shape == (B, C2, H, W), out.shape
    out_f32 = out.astype(jnp.float32)
    assert bool(jnp.all(jnp.isfinite(out_f32)))

    # validate against a pure-JAX f32 reference of the PyTorch module
    ref = jax.jit(lambda inp: c2f_od_reference(inp, params))(x)
    err = float(jnp.max(jnp.abs(out_f32 - ref)))
    scale = float(jnp.max(jnp.abs(ref)))
    assert err <= 0.05 * max(1.0, scale), (err, scale)

    print("KERNEL_OK")
</pallas_src>

<mosaic_0001>
module attributes {stable_mosaic.version = 11 : i64} {
  func.func @k(%arg0: memref<8x128xf32, #tpu.memory_space<vmem>>, %arg1: memref<8x128xf32, #tpu.memory_space<vmem>>) attributes {dimension_semantics = [], scalar_prefetch = 0 : i64, scratch_operands = 0 : i64, tpu.core_type = #tpu.core_type<tc>} {
    %c0 = arith.constant 0 : index
    %c0_0 = arith.constant 0 : index
    %0 = vector.load %arg0[%c0, %c0_0] : memref<8x128xf32, #tpu.memory_space<vmem>>, vector<8x128xf32>
    %c3_i32 = arith.constant 3 : i32
    %1 = tpu.dynamic_rotate %0 by %c3_i32 dim 1 : vector<8x128xf32>, i32 -> vector<8x128xf32>
    %c0_1 = arith.constant 0 : index
    %c0_2 = arith.constant 0 : index
    %2 = vector.load %arg1[%c0_1, %c0_2] : memref<8x128xf32, #tpu.memory_space<vmem>>, vector<8x128xf32>
    tpu.vector_store %arg1[%c0_1, %c0_2], %1 {strides = array<i32>} : memref<8x128xf32, #tpu.memory_space<vmem>>, vector<8x128xf32>,
    return
  }
}

</mosaic_0001>

<bundles_post_ra>
// kernel: tpu_custom_call.1
= control target key start
LH: loop header
LB: loop body
LE: loop exit
PB: predicated region body
PF: predicated region fallthrough
CT: control target
= control target key end

     0   :  { %6 = vsyncpa [#allocation3], 0  ;;  %s128_s0 = inlined_call_operand.hbm [shape: f32[8,128], index: 0, kind: input, shape index: {}]   ;;  %s129_s1 = inlined_call_operand.hbm [shape: f32[8,128], index: 1, kind: output, shape index: {}]  }
   0x1   :  { %7 = vsyncpa [#allocation4], 0  ;;  %s91_s6 = smov [#allocation2]   ;;  %s43_s10 = scalar_lea.hbm %s128_s0, 128 }
   0x2   :  { %s14_s7 = sshll.u32 %s91_s6, 4  ;;  %p44_p0 = scmp.ne.s32.totalorder %s128_s0, %s43_s10  ;;  %s15_s7 = int_to_ptr.vmem [resolvable:$true] %s14_s7 }
   0x3   :  { %p47_p1 = scmp.lt.u32.totalorder %s43_s10, %s128_s0 }
   0x5   :  { %p49_p2 = pnand %p47_p1, %p44_p0 }
   0x7   :  { %52 = shalt.err (!%p49_p2)
}
   0x8   :  { %s53_s15 = scalar_lea.vmem %s15_s7, 128  ;;  %p58_p4 = scmp.lt.s32.totalorder %s15_s7, %s15_s7 }
   0x9   :  { %p54_p3 = scmp.ne.s32.totalorder %s15_s7, %s53_s15  ;;  %p59_p5 = scmp.lt.s32.totalorder %s53_s15, %s53_s15 }
   0xb   :  { %p60_p6 = por %p59_p5, %p58_p4 }
   0xd   :  { %p61_p7 = pnand %p60_p6, %p54_p3 }
   0xf   :  { %64 = shalt.err (!%p61_p7)
}
  0x10   :  { %17 = dma.hbm_to_vmem [thread:$0]  %s128_s0, 128, %s15_s7, [#allocation3]  }
  0x11   :  { %87 = dma.done.wait [#allocation3], 128  }
  0x12   :  { %88 = vsyncadd [#allocation3], 4294967168  ;;  %v21_v0 = vld [vmem:[#allocation2] sm:$0xff]  ;;  %s92_s18 = smov 3   ;;  %s93_s19 = smov [#allocation5]  }
  0x13   :  { %22 = vrot.lane.b32.xlu0 %v21_v0, %s92_s18  ;;  %s31_s20 = sshll.u32 %s93_s19, 4  ;;  %s32_s20 = int_to_ptr.vmem [resolvable:$true] %s31_s20 }
  0x14   :  { %s65_s21 = scalar_lea.vmem %s32_s20, 128  ;;  %p70_p9 = scmp.lt.s32.totalorder %s32_s20, %s32_s20 }
  0x15   :  { %p66_p8 = scmp.ne.s32.totalorder %s32_s20, %s65_s21  ;;  %p71_p10 = scmp.lt.s32.totalorder %s65_s21, %s65_s21 }
  0x17   :  { %p72_p11 = por %p71_p10, %p70_p9 }
  0x19   :  { %p73_p12 = pnand %p72_p11, %p66_p8 }
  0x85   :  { %v23_v1 = vpop.permute.xlu0 %22 }
  0x86   :  { %24 = vst [vmem:[#allocation5] sm:$0xff] %v23_v1 }
  0x87   :  { %76 = shalt.err (!%p73_p12)
}
  0x88   :  { %s77_s0 = scalar_lea.hbm %s129_s1, 128 }
  0x89   :  { %p78_p13 = scmp.ne.s32.totalorder %s129_s1, %s77_s0  ;;  %p81_p0 = scmp.lt.u32.totalorder %s77_s0, %s129_s1 }
  0x8b   :  { %p83_p1 = pnand %p81_p0, %p78_p13 }
  0x8d   :  { %86 = shalt.err (!%p83_p1)
}
  0x8e   :  { %34 = dma.vmem_to_hbm [thread:$0]  %s32_s20, 128, %s129_s1, [#allocation4]  }
  0x8f   :  { %89 = dma.done.wait [#allocation4], 128  }
  0x90   :  { %90 = vsyncadd [#allocation4], 4294967168 }
  0x91   :  { %38 = vsyncpa [#allocation3], 1 }
  0x92   :  { %39 = vsyncpa [#allocation4], 1 }

</bundles_post_ra>
